<compile_context>
chip_gen: v7x
topology: tpu7x:2x2x1
jax: 0.10.0
libtpu: 0.0.40
codegen_flags: <defaults>
</compile_context>

<pallas_src>
import functools

import jax
import jax.numpy as jnp
from jax.experimental import pallas as pl
from jax.experimental.pallas import tpu as pltpu


def _focal_loss_kernel(preds_ref, labels_ref, alpha_ref, out_ref, acc_ref, *,
                       gamma, total_rows, block_cols):
    # preds_ref : (C, TM)  logits, class-major (native dtype, cast in-kernel)
    # labels_ref: (1, TM)  i32 class index per row
    # alpha_ref : (C, 1)   f32 per-class weight (constant block, VMEM-resident)
    # out_ref   : (1,1,1)  f32 this core's partial sum (written on last step)
    # acc_ref   : (1, TM)  f32 per-lane running partial sums
    core = pl.program_id(0)            # "parallel" axis: M-blocks split across TCs
    step = pl.program_id(1)            # "arbitrary" reduction axis
    n_steps = pl.num_programs(1)

    @pl.when(step == 0)
    def _init():
        acc_ref[...] = jnp.zeros_like(acc_ref)

    logits = preds_ref[...].astype(jnp.float32)              # (C, TM)
    c, tm = logits.shape

    # numerically-stable log-softmax along the class (sublane) axis
    col_max = jnp.max(logits, axis=0, keepdims=True)          # (1, TM)
    shifted = logits - col_max                                 # (C, TM)
    exp_shifted = jnp.exp(shifted)                             # (C, TM), one EUP pass
    denom = jnp.sum(exp_shifted, axis=0, keepdims=True)        # (1, TM)

    # gather(dim=1, index=labels) expressed as one shared one-hot masked reduce.
    # NOTE: out-of-range labels give an all-zero one-hot -> those rows
    # contribute 0 loss (PyTorch gather would error instead).
    row_iota = jax.lax.broadcasted_iota(jnp.int32, (c, tm), 0)
    onehot = (row_iota == labels_ref[...]).astype(jnp.float32)  # (C, TM)

    s_y = jnp.sum(shifted * onehot, axis=0, keepdims=True)        # (1, TM)
    exp_y = jnp.sum(exp_shifted * onehot, axis=0, keepdims=True)  # (1, TM)
    alpha_y = jnp.sum(alpha_ref[...] * onehot, axis=0, keepdims=True)

    logp_y = s_y - jnp.log(denom)                              # log softmax[label]
    # exact reciprocal for strict parity with the reference (kernel is
    # HBM-bound after the layout fix, so approx=True buys nothing here).
    p_y = exp_y * pl.reciprocal(denom, approx=False)           # softmax[label]

    one_minus = 1.0 - p_y
    g = float(gamma)
    if g == int(g) and 0 <= int(g) <= 4:
        # trace-time specialization: small integer gamma -> repeated multiplies
        focal = jnp.ones_like(one_minus)
        for _ in range(int(g)):
            focal = focal * one_minus
    else:
        focal = jnp.power(one_minus, g)

    loss = -alpha_y * focal * logp_y                           # (1, TM)

    # Mask using the *unclamped* block index: both the padded tail of the real
    # last block and any overshoot block handed to the second core (the
    # index_map clamps its DMA to a valid block) contribute exactly 0.
    raw_blk = core * n_steps + step
    col_ids = raw_blk * block_cols + jax.lax.broadcasted_iota(jnp.int32, (1, tm), 1)
    loss = jnp.where(col_ids < total_rows, loss, 0.0)

    acc_ref[...] += loss                                       # per-lane partials

    @pl.when(step == n_steps - 1)
    def _finalize():
        out_ref[...] = jnp.sum(acc_ref[...], axis=1, keepdims=True).reshape(1, 1, 1)


def focal_loss_pallas(preds, labels, alpha, *, gamma=2.0, size_average=True,
                      block_cols=65536):
    """preds: [B, N, C] or [B, C] float; labels: [B, N] or [B] int.

    block_cols is the M-tile on the lane axis (multiple of 128). At the
    default 65536 the class-major blocks are ~4 MiB (logits) + ~2 MiB (labels)
    per buffer; double-buffered plus the (1, TM) accumulator this is ~14 MiB,
    safely inside scoped VMEM on v5e/v6e/v7x while amortizing the ~0.35 us
    per-grid-step overhead.
    """
    C = preds.shape[-1]
    preds2d = preds.reshape(-1, C)                 # keep native dtype (bf16 ok)
    M = preds2d.shape[0]

    # class-major / lane-dense layout
    preds_cm = preds2d.T                                   # (C, M)
    labels_cm = labels.reshape(1, -1).astype(jnp.int32)    # (1, M)
    alpha_cm = alpha.reshape(C, 1).astype(jnp.float32)     # (C, 1)

    # Lane tile: full array if it fits in one block, else a multiple-of-128
    # tile; partial / overshoot blocks are masked inside the kernel.
    tm = M if M <= block_cols else block_cols
    nb = (M + tm - 1) // tm                 # number of M-blocks
    nb_half = (nb + 1) // 2                 # per-core share (2 TCs on v7x)
    last_blk = nb - 1

    def data_map(c, i):
        # clamp overshoot (odd nb) to a valid block; kernel masks it to zero
        return (0, jnp.minimum(c * nb_half + i, last_blk))

    kernel = functools.partial(
        _focal_loss_kernel, gamma=float(gamma), total_rows=M, block_cols=tm)

    out = pl.pallas_call(
        kernel,
        out_shape=jax.ShapeDtypeStruct((2, 1, 1), jnp.float32),  # per-core partials
        grid_spec=pltpu.PrefetchScalarGridSpec(
            num_scalar_prefetch=0,
            grid=(2, nb_half),
            in_specs=[
                pl.BlockSpec((C, tm), data_map),          # logits tile (class-major)
                pl.BlockSpec((1, tm), data_map),          # labels tile (lane-dense)
                pl.BlockSpec((C, 1), lambda c, i: (0, 0)),  # alpha, VMEM-resident
            ],
            out_specs=pl.BlockSpec((1, 1, 1), lambda c, i: (c, 0, 0)),
            scratch_shapes=[pltpu.VMEM((1, tm), jnp.float32)],   # per-lane accumulator
        ),
        compiler_params=pltpu.CompilerParams(
            dimension_semantics=("parallel", "arbitrary"),  # TC split, serial M-reduce
            vmem_limit_bytes=32 * 1024 * 1024,
        ),
    )(preds_cm, labels_cm, alpha_cm)

    total = jnp.sum(out)                     # sum the two per-core partials
    if size_average:
        total = total / M
    return total


def focal_loss_reference(preds, labels, alpha, *, gamma=2.0, size_average=True):
    # pure-JAX reference for sanity checking
    preds2d = preds.reshape(-1, preds.shape[-1]).astype(jnp.float32)
    lab = labels.reshape(-1).astype(jnp.int32)
    p = jax.nn.softmax(preds2d, axis=1)
    logp = jnp.log(p)
    p_y = jnp.take_along_axis(p, lab[:, None], axis=1)[:, 0]
    logp_y = jnp.take_along_axis(logp, lab[:, None], axis=1)[:, 0]
    a_y = alpha[lab]
    loss = -a_y * jnp.power(1.0 - p_y, gamma) * logp_y
    return jnp.mean(loss) if size_average else jnp.sum(loss)


if __name__ == "__main__":
    NUM_CLASS = 11
    ALPHA_SCALAR = 0.25
    GAMMA = 2.0

    # deterministic parameter init, matching the module's __init__:
    # alpha = [0.25, 0.75, 0.75, ..., 0.75]
    alpha = jnp.concatenate([
        jnp.array([ALPHA_SCALAR], dtype=jnp.float32),
        jnp.full((NUM_CLASS - 1,), 1.0 - ALPHA_SCALAR, dtype=jnp.float32),
    ])

    key = jax.random.PRNGKey(0)
    k1, k2, k3, k4 = jax.random.split(key, 4)

    # 1) small [B, N, C] case (single block, grid (2, 1))
    B, N = 2, 8
    preds = jax.random.normal(k1, (B, N, NUM_CLASS), dtype=jnp.float32)
    labels = jax.random.randint(k2, (B, N), 0, NUM_CLASS, dtype=jnp.int32)
    out = focal_loss_pallas(preds, labels, alpha, gamma=GAMMA, size_average=True)
    out = jax.block_until_ready(out)
    ref = focal_loss_reference(preds, labels, alpha, gamma=GAMMA, size_average=True)
    assert jnp.allclose(out, ref, atol=1e-5, rtol=1e-5), (out, ref)

    # 2) multi-block / partial-block / dual-core-split path, still small data:
    #    M = 1200 rows with a 256-row tile -> 5 blocks, grid (2, 3), core 1
    #    gets a clamped+masked overshoot block; sum (size_average=False).
    B2, N2 = 4, 300
    preds2 = jax.random.normal(k3, (B2, N2, NUM_CLASS), dtype=jnp.float32)
    labels2 = jax.random.randint(k4, (B2, N2), 0, NUM_CLASS, dtype=jnp.int32)
    out2 = focal_loss_pallas(preds2, labels2, alpha, gamma=GAMMA,
                             size_average=False, block_cols=256)
    out2 = jax.block_until_ready(out2)
    ref2 = focal_loss_reference(preds2, labels2, alpha, gamma=GAMMA,
                                size_average=False)
    assert jnp.allclose(out2, ref2, atol=1e-3, rtol=1e-5), (out2, ref2)

    print("KERNEL_OK")
</pallas_src>

<mosaic_0001>
module attributes {stable_mosaic.version = 11 : i64} {
  func.func @_focal_loss_kernel(%arg0: i32, %arg1: i32, %arg2: memref<11x16xf32, #tpu.memory_space<vmem>>, %arg3: memref<1x16xi32, #tpu.memory_space<vmem>>, %arg4: memref<11x1xf32, #tpu.memory_space<vmem>>, %arg5: memref<1x1x1xf32, #tpu.memory_space<vmem>>, %arg6: memref<1x16xf32, #tpu.memory_space<vmem>>) attributes {dimension_semantics = [#tpu.dimension_semantics<parallel>, #tpu.dimension_semantics<arbitrary>], iteration_bounds = array<i64: 2, 1>, scalar_prefetch = 0 : i64, scratch_operands = 1 : i64, tpu.core_type = #tpu.core_type<tc>, window_params = [{transform_indices = @transform_0, window_bounds = array<i64: 11, 16>}, {transform_indices = @transform_1, window_bounds = array<i64: 1, 16>}, {pipeline_mode = #tpu.pipeline_mode<synchronous>, transform_indices = @transform_2, window_bounds = array<i64: 11, 1>}, {transform_indices = @transform_3, window_bounds = array<i64: 1, 1, 1>}]} {
    %c0_i32 = arith.constant 0 : i32
    %0 = arith.cmpi eq, %arg1, %c0_i32 : i32
    %1 = arith.extui %0 : i1 to i32
    %c0_i32_0 = arith.constant 0 : i32
    %2 = arith.cmpi ne, %1, %c0_i32_0 : i32
    scf.if %2 {
      %cst_21 = arith.constant 0.000000e+00 : f32
      %57 = vector.broadcast %cst_21 : f32 to vector<1x16xf32>
      %c0_22 = arith.constant 0 : index
      %c0_23 = arith.constant 0 : index
      %58 = vector.load %arg6[%c0_22, %c0_23] : memref<1x16xf32, #tpu.memory_space<vmem>>, vector<1x16xf32>
      tpu.vector_store %arg6[%c0_22, %c0_23], %57 {strides = array<i32>} : memref<1x16xf32, #tpu.memory_space<vmem>>, vector<1x16xf32>,
    } else {
    }
    %c0 = arith.constant 0 : index
    %c0_1 = arith.constant 0 : index
    %3 = vector.load %arg2[%c0, %c0_1] : memref<11x16xf32, #tpu.memory_space<vmem>>, vector<11x16xf32>
    %cst = arith.constant dense<0xFF800000> : vector<16xf32>
    %4 = vector.multi_reduction <maximumf>, %3, %cst [0] : vector<11x16xf32> to vector<16xf32>
    %5 = vector.shape_cast %4 : vector<16xf32> to vector<1x16xf32>
    %6 = vector.broadcast %5 : vector<1x16xf32> to vector<11x16xf32>
    %7 = arith.subf %3, %6 : vector<11x16xf32>
    %8 = math.exp %7 : vector<11x16xf32>
    %cst_2 = arith.constant dense<0.000000e+00> : vector<16xf32>
    %9 = vector.multi_reduction <add>, %8, %cst_2 [0] : vector<11x16xf32> to vector<16xf32>
    %10 = vector.shape_cast %9 : vector<16xf32> to vector<1x16xf32>
    %11 = tpu.iota {dimensions = array<i32: 0>} : vector<11x16xi32>
    %c0_3 = arith.constant 0 : index
    %c0_4 = arith.constant 0 : index
    %12 = vector.load %arg3[%c0_3, %c0_4] : memref<1x16xi32, #tpu.memory_space<vmem>>, vector<1x16xi32>
    %13 = vector.broadcast %12 : vector<1x16xi32> to vector<11x16xi32>
    %14 = arith.cmpi eq, %11, %13 : vector<11x16xi32>
    %15 = arith.extui %14 : vector<11x16xi1> to vector<11x16xi32>
    %16 = arith.sitofp %15 : vector<11x16xi32> to vector<11x16xf32>
    %17 = arith.mulf %7, %16 : vector<11x16xf32>
    %cst_5 = arith.constant dense<0.000000e+00> : vector<16xf32>
    %18 = vector.multi_reduction <add>, %17, %cst_5 [0] : vector<11x16xf32> to vector<16xf32>
    %19 = vector.shape_cast %18 : vector<16xf32> to vector<1x16xf32>
    %20 = arith.mulf %8, %16 : vector<11x16xf32>
    %cst_6 = arith.constant dense<0.000000e+00> : vector<16xf32>
    %21 = vector.multi_reduction <add>, %20, %cst_6 [0] : vector<11x16xf32> to vector<16xf32>
    %22 = vector.shape_cast %21 : vector<16xf32> to vector<1x16xf32>
    %c0_7 = arith.constant 0 : index
    %c0_8 = arith.constant 0 : index
    %23 = vector.load %arg4[%c0_7, %c0_8] : memref<11x1xf32, #tpu.memory_space<vmem>>, vector<11x1xf32>
    %24 = vector.broadcast %23 : vector<11x1xf32> to vector<11x16xf32>
    %25 = arith.mulf %24, %16 : vector<11x16xf32>
    %cst_9 = arith.constant dense<0.000000e+00> : vector<16xf32>
    %26 = vector.multi_reduction <add>, %25, %cst_9 [0] : vector<11x16xf32> to vector<16xf32>
    %27 = vector.shape_cast %26 : vector<16xf32> to vector<1x16xf32>
    %28 = math.log %10 : vector<1x16xf32>
    %29 = arith.subf %19, %28 : vector<1x16xf32>
    %30 = tpu.reciprocal %10 : vector<1x16xf32> -> vector<1x16xf32>
    %31 = arith.mulf %22, %30 : vector<1x16xf32>
    %cst_10 = arith.constant 1.000000e+00 : f32
    %32 = vector.broadcast %cst_10 : f32 to vector<1x16xf32>
    %33 = arith.subf %32, %31 : vector<1x16xf32>
    %cst_11 = arith.constant 1.000000e+00 : f32
    %34 = vector.broadcast %cst_11 : f32 to vector<1x16xf32>
    %35 = arith.mulf %34, %33 : vector<1x16xf32>
    %36 = arith.mulf %35, %33 : vector<1x16xf32>
    %cst_12 = arith.constant 0.000000e+00 : f32
    %37 = vector.broadcast %cst_12 : f32 to vector<1x16xf32>
    %38 = arith.subf %37, %27 : vector<1x16xf32>
    %39 = arith.mulf %38, %36 : vector<1x16xf32>
    %40 = arith.mulf %39, %29 : vector<1x16xf32>
    %c1_i32 = arith.constant 1 : i32
    %41 = arith.muli %arg0, %c1_i32 : i32
    %42 = arith.addi %41, %arg1 : i32
    %c16_i32 = arith.constant 16 : i32
    %43 = arith.muli %42, %c16_i32 : i32
    %44 = tpu.iota {dimensions = array<i32: 1>} : vector<1x16xi32>
    %45 = vector.broadcast %43 : i32 to vector<1x16xi32>
    %46 = arith.addi %45, %44 : vector<1x16xi32>
    %c16_i32_13 = arith.constant 16 : i32
    %47 = vector.broadcast %c16_i32_13 : i32 to vector<1x16xi32>
    %48 = arith.cmpi slt, %46, %47 : vector<1x16xi32>
    %cst_14 = arith.constant 0.000000e+00 : f32
    %49 = vector.broadcast %cst_14 : f32 to vector<1x16xf32>
    %50 = arith.select %48, %40, %49 : vector<1x16xi1>, vector<1x16xf32>
    %c0_15 = arith.constant 0 : index
    %c0_16 = arith.constant 0 : index
    %51 = vector.load %arg6[%c0_15, %c0_16] : memref<1x16xf32, #tpu.memory_space<vmem>>, vector<1x16xf32>
    %52 = arith.addf %51, %50 : vector<1x16xf32>
    %c0_17 = arith.constant 0 : index
    %c0_18 = arith.constant 0 : index
    %53 = vector.load %arg6[%c0_17, %c0_18] : memref<1x16xf32, #tpu.memory_space<vmem>>, vector<1x16xf32>
    tpu.vector_store %arg6[%c0_17, %c0_18], %52 {strides = array<i32>} : memref<1x16xf32, #tpu.memory_space<vmem>>, vector<1x16xf32>,
    %c0_i32_19 = arith.constant 0 : i32
    %54 = arith.cmpi eq, %arg1, %c0_i32_19 : i32
    %55 = arith.extui %54 : i1 to i32
    %c0_i32_20 = arith.constant 0 : i32
    %56 = arith.cmpi ne, %55, %c0_i32_20 : i32
    scf.if %56 {
      %c0_21 = arith.constant 0 : index
      %c0_22 = arith.constant 0 : index
      %57 = vector.load %arg6[%c0_21, %c0_22] : memref<1x16xf32, #tpu.memory_space<vmem>>, vector<1x16xf32>
      %cst_23 = arith.constant dense<0.000000e+00> : vector<1xf32>
      %58 = vector.multi_reduction <add>, %57, %cst_23 [1] : vector<1x16xf32> to vector<1xf32>
      %59 = vector.shape_cast %58 : vector<1xf32> to vector<1x1xf32>
      %60 = vector.shape_cast %59 : vector<1x1xf32> to vector<1x1x1xf32>
      %c0_24 = arith.constant 0 : index
      %c0_25 = arith.constant 0 : index
      %c0_26 = arith.constant 0 : index
      %61 = vector.load %arg5[%c0_24, %c0_25, %c0_26] : memref<1x1x1xf32, #tpu.memory_space<vmem>>, vector<1x1x1xf32>
      tpu.vector_store %arg5[%c0_24, %c0_25, %c0_26], %60 {strides = array<i32>} : memref<1x1x1xf32, #tpu.memory_space<vmem>>, vector<1x1x1xf32>,
    } else {
    }
    return
  }
  func.func @transform_0(%arg0: i32, %arg1: i32) -> (i32, i32) {
    %c1_i32 = arith.constant 1 : i32
    %0 = arith.muli %arg0, %c1_i32 : i32
    %1 = arith.addi %0, %arg1 : i32
    %c0_i32 = arith.constant 0 : i32
    %2 = arith.minsi %1, %c0_i32 : i32
    %c0_i32_0 = arith.constant 0 : i32
    %c0_i32_1 = arith.constant 0 : i32
    return %c0_i32_0, %2 : i32, i32
  }
  func.func @transform_1(%arg0: i32, %arg1: i32) -> (i32, i32) {
    %c1_i32 = arith.constant 1 : i32
    %0 = arith.muli %arg0, %c1_i32 : i32
    %1 = arith.addi %0, %arg1 : i32
    %c0_i32 = arith.constant 0 : i32
    %2 = arith.minsi %1, %c0_i32 : i32
    %c0_i32_0 = arith.constant 0 : i32
    %c0_i32_1 = arith.constant 0 : i32
    return %c0_i32_0, %2 : i32, i32
  }
  func.func @transform_2(%arg0: i32, %arg1: i32) -> (i32, i32) {
    %c0_i32 = arith.constant 0 : i32
    %c0_i32_0 = arith.constant 0 : i32
    %c0_i32_1 = arith.constant 0 : i32
    return %c0_i32, %c0_i32_0 : i32, i32
  }
  func.func @transform_3(%arg0: i32, %arg1: i32) -> (i32, i32, i32) {
    %c0_i32 = arith.constant 0 : i32
    %c0_i32_0 = arith.constant 0 : i32
    %c0_i32_1 = arith.constant 0 : i32
    return %arg0, %c0_i32, %c0_i32_0 : i32, i32, i32
  }
}

</mosaic_0001>

<bundles_post_ra>
// kernel: tpu_custom_call.1
= control target key start
LH: loop header
LB: loop body
LE: loop exit
PB: predicated region body
PF: predicated region fallthrough
CT: control target
= control target key end

     0   :  { %s519_s12 = smov 0   ;;  %s521_s13 = smov 0   ;;  %s585_s0 = inlined_call_operand.vmem [shape: f32[11,16], index: 0, kind: input, shape index: {}]   ;;  %s586_s1 = inlined_call_operand.vmem [shape: s32[1,16], index: 1, kind: input, shape index: {}]   ;;  %s587_s2 = inlined_call_operand.vmem [shape: f32[11,1], index: 2, kind: input, shape index: {}]   ;;  %s588_s3 = inlined_call_operand.vmem [shape: f32[2,1,1], index: 3, kind: output, shape index: {}]  }
   0x1   :  { %s523_s14 = smov 0  }
   0x2 LB: > { %s25_s15 = sadd.s32 1, %s491_s13  ;;  %p424_p0 = scmp.ge.s32.totalorder %s495_s14, 1  ;;  %s495_s14 = sphi %s523_s14, %s13_s14   ;;  %s491_s13 = sphi %s521_s13, %s590_s13   ;;  %s487_s12 = sphi %s519_s12, %s589_s12  }
   0x3   : > { %p27_p1 = scmp.ge.s32.totalorder %s25_s15, 2  ;;  %p180_p2 = scmp.lt.s32.totalorder %s495_s14, 3 }
   0x5   : > { %s592_s15 = smov (%p27_p1, %s25_s15), 0  ;;  %p181_p3 = pnand %p424_p0, %p180_p2 }
   0x6   : > { %v302_v0 = vld [vmem:[%s587_s2] sm:$0xff] (!%p181_p3)  ;;  %v497_v1 = vmov (!%p181_p3), 0   ;;  %v303_v2 = vld [vmem:[%s587_s2 + $0x8] sm:$0x7] (!%p181_p3)  ;;  %vm236_vm0 = vcmask (!%p181_p3), 122880   ;;  %v498_v3 = vmov (!%p181_p3), 0.0   ;;  %v266_v19 = vlaneseq (!%p181_p3) }
   0x7   : > { %184 = sbr.rel (%p181_p3) target bundleno = 318 (0x13e), region = 32  ;;  %464 = vset.pattern.permute.xlu0 (!%p181_p3), %v497_v1  ;;  %237 = vst.msk [vmem:[#allocation2] sm:$0x1] (!%p181_p3), %vm236_vm0, %v498_v3  ;;  %p211_p4 = scmp.lt.s32.totalorder (!%p181_p3), %s487_s12, 0  ;;  %vm240_vm1 = vcmask (!%p181_p3), 130048   ;;  %vm242_vm2 = vcmask (!%p181_p3), 124928  }
   0x8   : > { %306 = vperm.xlu0 (!%p181_p3), %464, %v302_v0   ;;  %v267_v20 = vshrl.u32 (!%p181_p3), %v266_v19, 7  ;;  %s435_s28 = sshll.u32 (!%p181_p3), %s487_s12, 4  ;;  %p229_p5 = scmp.lt.s32.totalorder (!%p181_p3), %s487_s12, 1  ;;  %vm354_vm6 = vcmask (!%p181_p3), 0  }
   0xa   : > { %v268_v23 = vadd.s32 (!%p181_p3), 8, %v267_v20 }
   0xc   : > { %311 = vperm.xlu0 (!%p181_p3), %464, %v303_v2  }
   0xe   : > { %s212_s20 = scalar_select %p211_p4, %s487_s12, 0 }
   0xf   : > { %s596_s12 = smov (!%p229_p5, %s487_s12), 1 }
  0x10   : > { %s594_s20 = smov (!%p211_p4, %s212_s20), 0  ;;  %s231_s4 = scalar_lea.vmem %s588_s3, %s596_s12 }
  0x11   : > { %s428_s21 = sshll.u32 %s594_s20, 3  ;;  %s225_s27 = scalar_lea.vmem %s586_s1, %s594_s20 }
  0x12   : > { %s216_s24 = scalar_lea.vmem %s585_s0, %s428_s21  ;;  %v432_v25 = vld [vmem:[%s225_s27] ss:$0 sm:$0xff] }
  0x13   : > { %v238_v4 = vld [vmem:[%s216_s24] sm:$0xff]  ;;  %v239_v5 = vld [vmem:[%s216_s24 + $0x8] sm:$0x7]  ;;  %vm274_vm3 = vcmp.eq.s32.totalorder %v267_v20, %v432_v25  ;;  %vm275_vm4 = vcmp.eq.s32.totalorder %v268_v23, %v432_v25 }
  0x14   : > { %v241_v6 = vsel %vm240_vm1, %v238_v4, -inf  ;;  %v243_v7 = vsel %vm242_vm2, %v239_v5, -inf  ;;  %v433_v28 = vsel %vm274_vm3, 1.0, %v498_v3  ;;  %v434_v29 = vsel %vm275_vm4, 1.0, %v498_v3 }
  0x15   : > { %v244_v8 = vmax.f32 %v241_v6, %v243_v7 }
  0x17   : > { %v245_v9 = vrot.slane %v244_v8, 4 }
  0x19   : > { %v246_v10 = vmax.f32 %v244_v8, %v245_v9  ;;  %v338_v8 = vand.u32 127, %v266_v19  ;;  %v339_v9 = vstv %s435_s28 }
  0x1b   : > { %v247_v11 = vrot.slane %v246_v10, 2 }
  0x1d   : > { %v248_v12 = vmax.f32 %v246_v10, %v247_v11 }
  0x1f   : > { %v249_v13 = vrot.slane %v248_v12, 1 }
  0x21   : > { %v250_v14 = vmax.f32 %v248_v12, %v249_v13 }
  0x23   : > { %v251_v15 = vsub.f32 %v238_v4, %v250_v14  ;;  %v252_v16 = vsub.f32 %v239_v5, %v250_v14 }
  0x25   : > { %v253_v17 = vmul.f32 1.442695, %v251_v15  ;;  %v255_v18 = vmul.f32 1.442695, %v252_v16  ;;  %v280_v38 = vmul.f32 %v433_v28, %v251_v15  ;;  %v281_v40 = vmul.f32 %v434_v29, %v252_v16 }
  0x26   : > { %v340_v15 = vadd.s32 %v339_v9, %v338_v8 }
  0x27   : > { %465 = vpow2.f32 %v253_v17  ;;  %v282_v42 = vsel %vm240_vm1, %v280_v38, 0.0  ;;  %v283_v44 = vsel %vm242_vm2, %v281_v40, 0.0 }
  0x28   : > { %467 = vpow2.f32 %v255_v18  ;;  %v284_v46 = vadd.f32 %v283_v44, %v282_v42  ;;  %vm341_vm5 = vcmp.lt.s32.totalorder %v340_v15, 16 }
  0x2a   : > { %v285_v49 = vrot.slane %v284_v46, 4 }
  0x2c   : > { %v286_v52 = vadd.f32 %v285_v49, %v284_v46 }
  0x2e   : > { %v287_v57 = vrot.slane %v286_v52, 2 }
  0x30   : > { %v288_v63 = vadd.f32 %v287_v57, %v286_v52 }
  0x31   : > { %v466_v21 = vpop.eup %465 }
  0x32   : > { %v468_v22 = vpop.eup %467  ;;  %v257_v24 = vsel %vm240_vm1, %v466_v21, 0.0  ;;  %v291_v31 = vmul.f32 %v466_v21, %v433_v28  ;;  %v289_v3 = vrot.slane %v288_v63, 1  ;;  %v343_v21 = vld [vmem:[#allocation2] sm:$0x1] }
  0x33   : > { %v258_v26 = vsel %vm242_vm2, %v468_v22, 0.0  ;;  %v292_v32 = vmul.f32 %v468_v22, %v434_v29 }
  0x34   : > { %v259_v27 = vadd.f32 %v258_v26, %v257_v24  ;;  %v293_v34 = vsel %vm240_vm1, %v291_v31, 0.0  ;;  %v290_v10 = vadd.f32 %v289_v3, %v288_v63 }
  0x35   : > { %v294_v35 = vsel %vm242_vm2, %v292_v32, 0.0 }
  0x36   : > { %v260_v30 = vrot.slane %v259_v27, 4  ;;  %v295_v37 = vadd.f32 %v294_v35, %v293_v34 }
  0x38   : > { %v261_v33 = vadd.f32 %v260_v30, %v259_v27  ;;  %v296_v41 = vrot.slane %v295_v37, 4 }
  0x3a   : > { %v262_v36 = vrot.slane %v261_v33, 2  ;;  %v297_v45 = vadd.f32 %v296_v41, %v295_v37 }
  0x3c   : > { %v263_v39 = vadd.f32 %v262_v36, %v261_v33  ;;  %v298_v48 = vrot.slane %v297_v45, 2 }
  0x3e   : > { %v264_v43 = vrot.slane %v263_v39, 1  ;;  %v299_v51 = vadd.f32 %v298_v48, %v297_v45 }
  0x40   : > { %v265_v47 = vadd.f32 %v264_v43, %v263_v39  ;;  %v300_v55 = vrot.slane %v299_v51, 1 }
  0x42   : > { %469 = vrcp.f32 %v265_v47  ;;  %v301_v60 = vadd.f32 %v300_v55, %v299_v51 }
  0x43   : > { %471 = vlog2.f32 %v265_v47 }
  0x4c   : > { %v470_v62 = vpop.eup %469 }
  0x4d   : > { %v329_v2 = vmul.f32 %v470_v62, %v301_v60  ;;  %v472_v5 = vpop.eup %471 }
  0x4e   : > { %v326_v12 = vmul.f32 0.6931472, %v472_v5 }
  0x4f   : > { %v330_v7 = vsub.f32 1.0, %v329_v2 }
  0x50   : > { %v327_v17 = vsub.f32 %v290_v10, %v326_v12 }
  0x51   : > { %v331_v14 = vmul.f32 %v330_v7, %v330_v7 }
  0x87   : > { %v307_v50 = vpop.permute.xlu0 %306 }
  0x88   : > { %v314_v53 = vmul.f32 %v433_v28, %v307_v50 }
  0x8a   : > { %v316_v58 = vsel %vm240_vm1, %v314_v53, 0.0 }
  0x8b   : > { %v312_v54 = vpop.permute.xlu0 %311 }
  0x8c   : > { %v315_v56 = vmul.f32 %v434_v29, %v312_v54 }
  0x8e   : > { %v317_v59 = vsel %vm242_vm2, %v315_v56, 0.0 }
  0x8f   : > { %v318_v61 = vadd.f32 %v317_v59, %v316_v58 }
  0x91   : > { %v319_v0 = vrot.slane %v318_v61, 4 }
  0x93   : > { %v320_v1 = vadd.f32 %v319_v0, %v318_v61 }
  0x95   : > { %v321_v4 = vrot.slane %v320_v1, 2 }
  0x97   : > { %v322_v6 = vadd.f32 %v321_v4, %v320_v1 }
  0x99   : > { %v323_v11 = vrot.slane %v322_v6, 1 }
  0x9b   : > { %v324_v13 = vadd.f32 %v323_v11, %v322_v6 }
  0x9d   : > { %v332_v16 = vsub.f32 0.0, %v324_v13 }
  0x9f   : > { %v333_v18 = vmul.f32 %v332_v16, %v331_v14 }
  0xa1   : > { %v334_v20 = vmul.f32 %v333_v18, %v327_v17 }
  0xa3   : > { %v342_v22 = vsel %vm341_vm5, %v334_v20, 0.0 }
  0xa4   : > { %v344_v23 = vadd.f32 %v343_v21, %v342_v22 }
  0xa6   : > { %346 = vst.msk [vmem:[#allocation2] sm:$0x1] %vm236_vm0, %v344_v23 }
  0xad   : > { %v350_v19 = vld [vmem:[#allocation2] sm:$0x1] }
  0xae   : > { %v351_v24 = vsel %vm236_vm0, %v350_v19, 0.0 }
  0xaf   : > { %352 = vadd.xlane.f32.xlu1 %v351_v24 }
 0x13c   : > { %v353_v25 = vpop.xlane.xlu1 %352 }
 0x13d   : > { %355 = vst.msk [vmem:[%s231_s4] sm:$0x1] %vm354_vm6, %v353_v25 }
 0x13e PF: > { %s13_s14 = sadd.s32 1, %s495_s14   ;;  %s589_s12 = smov %s491_s13 }
 0x13f   : > { %p10_p6 = scmp.ge.s32.totalorder %s13_s14, 4   ;;  %s590_s13 = smov %s592_s15 }
 0x141   :  { %12 = sbr.rel (!%p10_p6) target bundleno = 2 (0x2), region = 73 }

</bundles_post_ra>
